<compile_context>
chip_gen: v6e
topology: v6e:2x2x1
jax: 0.10.0
libtpu: 0.0.40
codegen_flags: <defaults>
</compile_context>

<pallas_src>
import functools

import jax
import jax.numpy as jnp
from jax.experimental import pallas as pl
from jax.experimental.pallas import tpu as pltpu


def _se_block_kernel(x_ref, w1_ref, b1_ref, w2_ref, b2_ref, out_ref, acc_ref,
                     *, hw, tile_hw, needs_mask):
    # x_ref: (n_blk, C, tile_hw)   w1_ref: (C, M)   b1_ref: (1, M)
    # w2_ref: (M, C)               b2_ref: (1, C)
    # out_ref: (n_blk, C, 1)       acc_ref: (n_blk, C) f32 scratch (spatial sums)
    k = pl.program_id(1)

    @pl.when(k == 0)
    def _init():
        acc_ref[...] = jnp.zeros_like(acc_ref)

    # Hot loop: partial spatial sum for this HW tile.  1/HW is folded into w1 by
    # the wrapper, so this stays pure load + (mask) + add and hides under DMA.
    x = x_ref[...].astype(jnp.float32)            # (n_blk, C, tile_hw)
    if needs_mask:
        # The last HW tile may extend past the true spatial extent (no wrapper
        # pad).  Zero the tail before summing — cheap VPU work.
        lane = jax.lax.broadcasted_iota(jnp.int32, x.shape, dimension=2)
        x = jnp.where(lane + k * tile_hw < hw, x, 0.0)
    acc_ref[...] += jnp.sum(x, axis=-1)           # (n_blk, C)

    @pl.when(k == pl.num_programs(1) - 1)
    def _finalize():
        pooled = acc_ref[...]                     # raw sums; 1/HW scale lives in w1
        # conv1 (1x1) == dense:  (n_blk, C) @ (C, M) + b1, then ReLU
        h = jnp.dot(pooled, w1_ref[...],
                    preferred_element_type=jnp.float32) + b1_ref[...]
        h = jnp.maximum(h, 0.0)
        # conv2 (1x1) == dense:  (n_blk, M) @ (M, C) + b2, then Sigmoid
        y = jnp.dot(h, w2_ref[...],
                    preferred_element_type=jnp.float32) + b2_ref[...]
        out_ref[...] = jax.nn.sigmoid(y).astype(out_ref.dtype)[:, :, None]


def _round_up(a, b):
    return -(-a // b) * b


def _largest_divisor_leq(n, cap):
    cap = max(1, min(n, cap))
    for d in range(cap, 0, -1):
        if n % d == 0:
            return d
    return 1


def se_block_forward(x_nchw, w1, b1, w2, b2, *, vmem_budget_bytes=8 * 1024 * 1024):
    """SE_Block forward gate.

    x_nchw: (N, C, H, W). w1: (M, C, 1, 1), b1: (M,), w2: (C, M, 1, 1), b2: (C,).
    Returns the sigmoid gate with shape (N, C, 1, 1) (same as the PyTorch forward).
    """
    n, c, h, w = x_nchw.shape
    m = w1.shape[0]
    hw = h * w
    itemsize = jnp.dtype(x_nchw.dtype).itemsize

    # Free NCHW -> (N, C, H*W) reshape; spatial (reduction) axis maps to lanes.
    x_flat = x_nchw.reshape(n, c, hw)

    # 1x1 convs on a (1,1) map are dense layers; pre-transpose once and fold the
    # 1/HW pooling normalization into w1 (the first conv is linear).
    w1t = (w1.reshape(m, c).T.astype(jnp.float32)) * (1.0 / hw)   # (C, M)
    w2t = w2.reshape(c, m).T.astype(jnp.float32)                  # (M, C)
    b1r = b1.reshape(1, m).astype(jnp.float32)
    b2r = b2.reshape(1, c).astype(jnp.float32)

    # ---- adaptive blocking -----------------------------------------------------
    item_bytes = c * hw * itemsize
    if item_bytes <= vmem_budget_bytes:
        # Whole spatial map(s) fit: no HW tiling, no padding, no masking.
        tile_hw = hw                                   # full-dim block (128-rule exempt)
        n_blk = _largest_divisor_leq(n, vmem_budget_bytes // item_bytes)
        # v7x megacore: keep >=2 programs on the "parallel" batch axis, but only
        # when the halved step stays big enough that v5e/v6e don't lose roofline.
        if n // n_blk == 1 and n_blk % 2 == 0 and (n_blk // 2) * item_bytes >= 2 * 1024 * 1024:
            n_blk //= 2
    else:
        # One batch item's spatial map exceeds the budget: tile the spatial axis.
        n_blk = 1
        max_tile = max(128, (vmem_budget_bytes // (c * itemsize)) // 128 * 128)
        tile_hw = min(max_tile, _round_up(hw, 128))
        if tile_hw > hw:                               # huge-C, tiny-HW corner case
            tile_hw = hw                               # full-dim block (128-rule exempt)

    grid_i = n // n_blk
    grid_k = pl.cdiv(hw, tile_hw)
    needs_mask = (hw % tile_hw) != 0                   # partial last HW tile

    # Deeper x pipeline when there are enough HW tiles (helps v7x, neutral elsewhere).
    x_buffers = 3 if grid_k >= 4 else 2

    # ---- VMEM accounting (v7x has only 64 MiB/TC: cap at 40 MiB) ---------------
    step_bytes = n_blk * c * tile_hw * itemsize
    resident_bytes = 2 * (c * m + m * c + m + c) * 4   # weights/biases (double-buffered)
    misc_bytes = n_blk * c * 4 + 2 * n_blk * c * itemsize
    vmem_needed = x_buffers * step_bytes + resident_bytes + misc_bytes
    vmem_limit = int(min(40 * 1024 * 1024,
                         max(16 * 1024 * 1024, vmem_needed + 4 * 1024 * 1024)))

    x_index_map = lambda i, k: (i, 0, k)
    if x_buffers != 2:
        x_spec = pl.BlockSpec((n_blk, c, tile_hw), x_index_map,
                              pipeline_mode=pl.Buffered(x_buffers))
    else:
        x_spec = pl.BlockSpec((n_blk, c, tile_hw), x_index_map)

    cost = pl.CostEstimate(
        flops=int(n * c * hw + 4 * n * c * m),
        transcendentals=int(n * c),
        bytes_accessed=int(n * c * hw * itemsize
                           + (c * m + m * c + m + c) * 4
                           + n * c * itemsize),
    )

    kernel = functools.partial(_se_block_kernel,
                               hw=hw, tile_hw=tile_hw, needs_mask=needs_mask)

    out = pl.pallas_call(
        kernel,
        out_shape=jax.ShapeDtypeStruct((n, c, 1), x_nchw.dtype),
        grid=(grid_i, grid_k),
        in_specs=[
            x_spec,
            # Weights/biases: constant block index -> DMA'd once, stay resident.
            pl.BlockSpec((c, m), lambda i, k: (0, 0)),
            pl.BlockSpec((1, m), lambda i, k: (0, 0)),
            pl.BlockSpec((m, c), lambda i, k: (0, 0)),
            pl.BlockSpec((1, c), lambda i, k: (0, 0)),
        ],
        out_specs=pl.BlockSpec((n_blk, c, 1), lambda i, k: (i, 0, 0)),
        scratch_shapes=[pltpu.VMEM((n_blk, c), jnp.float32)],
        compiler_params=pltpu.CompilerParams(
            dimension_semantics=("parallel", "arbitrary"),
            vmem_limit_bytes=vmem_limit,
        ),
        cost_estimate=cost,
    )(x_flat, w1t, b1r, w2t, b2r)

    # Match PyTorch output shape (N, C, 1, 1) — forward returns the gate only.
    # TODO(synk): if the caller immediately applies x * gate, fuse that scale into
    # this kernel family (second pass over the same HW tiles) instead of letting
    # XLA re-read all of x — that halves the dominant HBM traffic at the layer level.
    return out.reshape(n, c, 1, 1)


def _init_params(key, in_planes):
    """Deterministic synthetic init matching nn.Conv2d parameter shapes."""
    mid = in_planes // 16
    k1, k2, k3, k4 = jax.random.split(key, 4)
    bound1 = 1.0 / jnp.sqrt(in_planes)
    bound2 = 1.0 / jnp.sqrt(mid)
    w1 = jax.random.uniform(k1, (mid, in_planes, 1, 1), jnp.float32, -bound1, bound1)
    b1 = jax.random.uniform(k2, (mid,), jnp.float32, -bound1, bound1)
    w2 = jax.random.uniform(k3, (in_planes, mid, 1, 1), jnp.float32, -bound2, bound2)
    b2 = jax.random.uniform(k4, (in_planes,), jnp.float32, -bound2, bound2)
    return w1, b1, w2, b2


def _reference(x, w1, b1, w2, b2):
    n, c, _, _ = x.shape
    m = w1.shape[0]
    pooled = jnp.mean(x, axis=(2, 3))                                  # (N, C)
    hmid = jnp.maximum(pooled @ w1.reshape(m, c).T + b1, 0.0)
    return jax.nn.sigmoid(hmid @ w2.reshape(c, m).T + b2).reshape(n, c, 1, 1)


if __name__ == "__main__":
    key = jax.random.PRNGKey(0)
    kx, kp = jax.random.split(key)

    C = 32                                   # in_planes=32 -> mid=2
    w1, b1, w2, b2 = _init_params(kp, C)

    # (shape, vmem_budget) configs exercising every code path:
    #  1) fits-in-budget, HW multiple of 128 (single tile, no mask)
    #  2) fits-in-budget, 7x7 map (full-dim block, 128-rule exemption, no pad)
    #  3) tiny budget -> HW tiling with a masked partial last tile
    #  4) tiny budget -> 4 HW tiles, exact split, deeper (3x) x pipeline
    configs = [
        ((2, C, 16, 16), 8 * 1024 * 1024),
        ((2, C, 7, 7), 8 * 1024 * 1024),
        ((2, C, 20, 20), 32 * 1024),
        ((1, C, 32, 32), 32 * 1024),
    ]

    for idx, (shape, budget) in enumerate(configs):
        kxi = jax.random.fold_in(kx, idx)
        x = jax.random.normal(kxi, shape, jnp.float32)
        out = se_block_forward(x, w1, b1, w2, b2, vmem_budget_bytes=budget)
        out = jax.block_until_ready(out)
        ref = _reference(x, w1, b1, w2, b2)
        assert out.shape == (shape[0], C, 1, 1)
        assert jnp.allclose(out, ref, atol=1e-5, rtol=1e-5), f"mismatch for config {idx}"

    print("KERNEL_OK")
</pallas_src>

<mosaic_0001>
module attributes {stable_mosaic.version = 11 : i64} {
  func.func @_se_block_kernel(%arg0: i32, %arg1: i32, %arg2: memref<2x32x256xf32, #tpu.memory_space<vmem>>, %arg3: memref<32x2xf32, #tpu.memory_space<vmem>>, %arg4: memref<1x2xf32, #tpu.memory_space<vmem>>, %arg5: memref<2x32xf32, #tpu.memory_space<vmem>>, %arg6: memref<1x32xf32, #tpu.memory_space<vmem>>, %arg7: memref<2x32x1xf32, #tpu.memory_space<vmem>>, %arg8: memref<2x32xf32, #tpu.memory_space<vmem>>) attributes {dimension_semantics = [#tpu.dimension_semantics<parallel>, #tpu.dimension_semantics<arbitrary>], iteration_bounds = array<i64: 1, 1>, scalar_prefetch = 0 : i64, scratch_operands = 1 : i64, tpu.core_type = #tpu.core_type<tc>, window_params = [{transform_indices = @transform_0, window_bounds = array<i64: 2, 32, 256>}, {pipeline_mode = #tpu.pipeline_mode<synchronous>, transform_indices = @transform_1, window_bounds = array<i64: 32, 2>}, {pipeline_mode = #tpu.pipeline_mode<synchronous>, transform_indices = @transform_2, window_bounds = array<i64: 1, 2>}, {pipeline_mode = #tpu.pipeline_mode<synchronous>, transform_indices = @transform_3, window_bounds = array<i64: 2, 32>}, {pipeline_mode = #tpu.pipeline_mode<synchronous>, transform_indices = @transform_4, window_bounds = array<i64: 1, 32>}, {transform_indices = @transform_5, window_bounds = array<i64: 2, 32, 1>}]} {
    %c0_i32 = arith.constant 0 : i32
    %0 = arith.cmpi eq, %arg1, %c0_i32 : i32
    %1 = arith.extui %0 : i1 to i32
    %c0_i32_0 = arith.constant 0 : i32
    %2 = arith.cmpi ne, %1, %c0_i32_0 : i32
    scf.if %2 {
      %cst_9 = arith.constant 0.000000e+00 : f32
      %11 = vector.broadcast %cst_9 : f32 to vector<2x32xf32>
      %c0_10 = arith.constant 0 : index
      %c0_11 = arith.constant 0 : index
      %12 = vector.load %arg8[%c0_10, %c0_11] : memref<2x32xf32, #tpu.memory_space<vmem>>, vector<2x32xf32>
      tpu.vector_store %arg8[%c0_10, %c0_11], %11 {strides = array<i32>} : memref<2x32xf32, #tpu.memory_space<vmem>>, vector<2x32xf32>,
    } else {
    }
    %c0 = arith.constant 0 : index
    %c0_1 = arith.constant 0 : index
    %c0_2 = arith.constant 0 : index
    %3 = vector.load %arg2[%c0, %c0_1, %c0_2] : memref<2x32x256xf32, #tpu.memory_space<vmem>>, vector<2x32x256xf32>
    %c0_3 = arith.constant 0 : index
    %c0_4 = arith.constant 0 : index
    %4 = vector.load %arg8[%c0_3, %c0_4] : memref<2x32xf32, #tpu.memory_space<vmem>>, vector<2x32xf32>
    %cst = arith.constant dense<0.000000e+00> : vector<2x32xf32>
    %5 = vector.multi_reduction <add>, %3, %cst [2] : vector<2x32x256xf32> to vector<2x32xf32>
    %6 = arith.addf %4, %5 : vector<2x32xf32>
    %c0_5 = arith.constant 0 : index
    %c0_6 = arith.constant 0 : index
    %7 = vector.load %arg8[%c0_5, %c0_6] : memref<2x32xf32, #tpu.memory_space<vmem>>, vector<2x32xf32>
    tpu.vector_store %arg8[%c0_5, %c0_6], %6 {strides = array<i32>} : memref<2x32xf32, #tpu.memory_space<vmem>>, vector<2x32xf32>,
    %c0_i32_7 = arith.constant 0 : i32
    %8 = arith.cmpi eq, %arg1, %c0_i32_7 : i32
    %9 = arith.extui %8 : i1 to i32
    %c0_i32_8 = arith.constant 0 : i32
    %10 = arith.cmpi ne, %9, %c0_i32_8 : i32
    scf.if %10 {
      %c0_9 = arith.constant 0 : index
      %c0_10 = arith.constant 0 : index
      %11 = vector.load %arg8[%c0_9, %c0_10] : memref<2x32xf32, #tpu.memory_space<vmem>>, vector<2x32xf32>
      %c0_11 = arith.constant 0 : index
      %c0_12 = arith.constant 0 : index
      %12 = vector.load %arg3[%c0_11, %c0_12] : memref<32x2xf32, #tpu.memory_space<vmem>>, vector<32x2xf32>
      %cst_13 = arith.constant dense<0.000000e+00> : vector<2x2xf32>
      %13 = tpu.matmul %11, %12, %cst_13 {dimension_numbers = #tpu.dot_dimension_numbers<[1], [0], [0], [1], [0, 0, 1, 1], [], []>} : vector<2x32xf32>, vector<32x2xf32>, vector<2x2xf32> -> vector<2x2xf32>
      %c0_14 = arith.constant 0 : index
      %c0_15 = arith.constant 0 : index
      %14 = vector.load %arg4[%c0_14, %c0_15] : memref<1x2xf32, #tpu.memory_space<vmem>>, vector<1x2xf32>
      %15 = vector.broadcast %14 : vector<1x2xf32> to vector<2x2xf32>
      %16 = arith.addf %13, %15 : vector<2x2xf32>
      %cst_16 = arith.constant 0.000000e+00 : f32
      %17 = vector.broadcast %cst_16 : f32 to vector<2x2xf32>
      %18 = arith.maximumf %16, %17 : vector<2x2xf32>
      %c0_17 = arith.constant 0 : index
      %c0_18 = arith.constant 0 : index
      %19 = vector.load %arg5[%c0_17, %c0_18] : memref<2x32xf32, #tpu.memory_space<vmem>>, vector<2x32xf32>
      %cst_19 = arith.constant dense<0.000000e+00> : vector<2x32xf32>
      %20 = tpu.matmul %18, %19, %cst_19 {dimension_numbers = #tpu.dot_dimension_numbers<[1], [0], [0], [1], [0, 0, 1, 1], [], []>} : vector<2x2xf32>, vector<2x32xf32>, vector<2x32xf32> -> vector<2x32xf32>
      %c0_20 = arith.constant 0 : index
      %c0_21 = arith.constant 0 : index
      %21 = vector.load %arg6[%c0_20, %c0_21] : memref<1x32xf32, #tpu.memory_space<vmem>>, vector<1x32xf32>
      %22 = vector.broadcast %21 : vector<1x32xf32> to vector<2x32xf32>
      %23 = arith.addf %20, %22 : vector<2x32xf32>
      %24 = arith.negf %23 : vector<2x32xf32>
      %25 = math.exp %24 : vector<2x32xf32>
      %cst_22 = arith.constant 1.000000e+00 : f32
      %26 = vector.broadcast %cst_22 : f32 to vector<2x32xf32>
      %27 = arith.addf %26, %25 : vector<2x32xf32>
      %28 = arith.divf %26, %27 : vector<2x32xf32>
      %29 = vector.shape_cast %28 : vector<2x32xf32> to vector<2x32x1xf32>
      %c0_23 = arith.constant 0 : index
      %c0_24 = arith.constant 0 : index
      %c0_25 = arith.constant 0 : index
      %30 = vector.load %arg7[%c0_23, %c0_24, %c0_25] : memref<2x32x1xf32, #tpu.memory_space<vmem>>, vector<2x32x1xf32>
      tpu.vector_store %arg7[%c0_23, %c0_24, %c0_25], %29 {strides = array<i32>} : memref<2x32x1xf32, #tpu.memory_space<vmem>>, vector<2x32x1xf32>,
    } else {
    }
    return
  }
  func.func @transform_0(%arg0: i32, %arg1: i32) -> (i32, i32, i32) {
    %c0_i32 = arith.constant 0 : i32
    %c0_i32_0 = arith.constant 0 : i32
    return %arg0, %c0_i32, %arg1 : i32, i32, i32
  }
  func.func @transform_1(%arg0: i32, %arg1: i32) -> (i32, i32) {
    %c0_i32 = arith.constant 0 : i32
    %c0_i32_0 = arith.constant 0 : i32
    %c0_i32_1 = arith.constant 0 : i32
    return %c0_i32, %c0_i32_0 : i32, i32
  }
  func.func @transform_2(%arg0: i32, %arg1: i32) -> (i32, i32) {
    %c0_i32 = arith.constant 0 : i32
    %c0_i32_0 = arith.constant 0 : i32
    %c0_i32_1 = arith.constant 0 : i32
    return %c0_i32, %c0_i32_0 : i32, i32
  }
  func.func @transform_3(%arg0: i32, %arg1: i32) -> (i32, i32) {
    %c0_i32 = arith.constant 0 : i32
    %c0_i32_0 = arith.constant 0 : i32
    %c0_i32_1 = arith.constant 0 : i32
    return %c0_i32, %c0_i32_0 : i32, i32
  }
  func.func @transform_4(%arg0: i32, %arg1: i32) -> (i32, i32) {
    %c0_i32 = arith.constant 0 : i32
    %c0_i32_0 = arith.constant 0 : i32
    %c0_i32_1 = arith.constant 0 : i32
    return %c0_i32, %c0_i32_0 : i32, i32
  }
  func.func @transform_5(%arg0: i32, %arg1: i32) -> (i32, i32, i32) {
    %c0_i32 = arith.constant 0 : i32
    %c0_i32_0 = arith.constant 0 : i32
    %c0_i32_1 = arith.constant 0 : i32
    return %arg0, %c0_i32, %c0_i32_0 : i32, i32, i32
  }
}

</mosaic_0001>

<bundles_post_ra>
// kernel: tpu_custom_call.1
= control target key start
LH: loop header
LB: loop body
LE: loop exit
PB: predicated region body
PF: predicated region fallthrough
CT: control target
= control target key end

     0   :  { %10 = vsyncpa [#allocation4], 0  ;;  %s435_s18 = smov [#allocation3]   ;;  %s536_s0 = inlined_call_operand.hbm [shape: f32[2,32,256], index: 0, kind: input, shape index: {}]   ;;  %s537_s1 = inlined_call_operand.vmem [shape: f32[32,2], index: 1, kind: input, shape index: {}]   ;;  %s538_s2 = inlined_call_operand.vmem [shape: f32[1,2], index: 2, kind: input, shape index: {}]   ;;  %s539_s3 = inlined_call_operand.vmem [shape: f32[2,32], index: 3, kind: input, shape index: {}]   ;;  %s540_s4 = inlined_call_operand.vmem [shape: f32[1,32], index: 4, kind: input, shape index: {}]   ;;  %s541_s5 = inlined_call_operand.vmem [shape: f32[2,32,1], index: 5, kind: output, shape index: {}]  }
   0x1   :  { %s16_s19 = sshll.u32 %s435_s18, 4  ;;  %s17_s19 = int_to_ptr.vmem [resolvable:$true] %s16_s19 }
   0x2   :  { %s421_s20 = scalar_lea.vmem %s17_s19, 2048  ;;  %p426_p1 = scmp.lt.s32.totalorder %s17_s19, %s17_s19 }
   0x3   :  { %p422_p0 = scmp.ne.s32.totalorder %s17_s19, %s421_s20  ;;  %p427_p2 = scmp.lt.s32.totalorder %s421_s20, %s421_s20 }
   0x5   :  { %p428_p3 = por %p427_p2, %p426_p1 }
   0x7   :  { %p429_p4 = pnand %p428_p3, %p422_p0 }
   0x9   :  { %432 = shalt.err (!%p429_p4)
}
   0xa   :  { %s436_s21 = smov 256   ;;  %s437_s22 = smov 16  }
   0xb   :  { %22 = dma.hbm_to_vmem [thread:$0]  %s536_s0, 2048, %s17_s19, [#allocation4], %s436_s21, %s436_s21, %s437_s22  }
   0xc   :  { %433 = dma.done.wait [#allocation4], 2048  }
   0xd   :  { %434 = vsyncadd [#allocation4], 4294965248  ;;  %v48_v0 = vld [vmem:[#allocation3 + $0x40] sm:$0xff]  ;;  %v49_v1 = vld [vmem:[#allocation3 + $0x48] sm:$0xff]  ;;  %vm38_vm0 = vcmask 254976   ;;  %v438_v24 = vmov 0.0   ;;  %v89_v29 = vlaneseq }
   0xe   :  { %v40_v2 = vld [vmem:[#allocation3] sm:$0xff]  ;;  %v69_v3 = vadd.f32 %v49_v1, %v48_v0  ;;  %v41_v4 = vld [vmem:[#allocation3 + $0x8] sm:$0xff]  ;;  %v50_v5 = vld [vmem:[#allocation3 + $0x50] sm:$0xff]  ;;  %39 = vst.msk [vmem:[#allocation2] sm:$0x3] %vm38_vm0, %v438_v24  ;;  %388 = vmatprep.subr.mxu0 %v438_v24  ;;  %399 = vmatprep.subr.mxu1 %v438_v24  ;;  %vm439_vm1 = vmmov 0  }
   0xf   :  { %v51_v6 = vld [vmem:[#allocation3 + $0x58] sm:$0xff]  ;;  %v57_v7 = vadd.f32 %v41_v4, %v40_v2  ;;  %v42_v8 = vld [vmem:[#allocation3 + $0x10] sm:$0xff]  ;;  %v52_v12 = vld [vmem:[#allocation3 + $0x60] sm:$0xff]  ;;  %396 = vmatprep.mubr.msk.f32.mxu0 %vm439_vm1, %v438_v24  ;;  %401 = vmatprep.mubr.msk.f32.mxu1 %vm439_vm1, %v438_v24  ;;  %v90_v30 = vand.u32 127, %v89_v29  ;;  %v486_v35 = vshrl.u32 %v89_v29, 7  ;;  %vm100_vm2 = vcmask 130112  }
  0x10   :  { %v43_v9 = vld [vmem:[#allocation3 + $0x18] sm:$0xff]  ;;  %70 = vadd.xlane.f32.xlu1 %v69_v3  ;;  %v72_v10 = vadd.f32 %v51_v6, %v50_v5  ;;  %v53_v13 = vld [vmem:[#allocation3 + $0x68] sm:$0xff]  ;;  %v44_v14 = vld [vmem:[#allocation3 + $0x20] sm:$0xff]  ;;  %vm107_vm3 = vcmask 195712   ;;  %vm114_vm4 = vcmask 261312   ;;  %vm135_vm5 = vcmask 1041409  }
  0x11   :  { %58 = vadd.xlane.f32.xlu0 %v57_v7  ;;  %v60_v11 = vadd.f32 %v43_v9, %v42_v8  ;;  %v45_v15 = vld [vmem:[#allocation3 + $0x28] sm:$0xff]  ;;  %v75_v16 = vadd.f32 %v53_v13, %v52_v12  ;;  %v54_v18 = vld [vmem:[#allocation3 + $0x70] sm:$0xff]  ;;  %v55_v19 = vld [vmem:[#allocation3 + $0x78] sm:$0xff]  ;;  %v95_v33 = vadd.s32 4294967288, %v90_v30  ;;  %v102_v34 = vadd.s32 4294967280, %v90_v30 }
  0x12   :  { %v63_v17 = vadd.f32 %v45_v15, %v44_v14  ;;  %v46_v20 = vld [vmem:[#allocation3 + $0x30] sm:$0xff]  ;;  %v47_v21 = vld [vmem:[#allocation3 + $0x38] sm:$0xff]  ;;  %v78_v22 = vadd.f32 %v55_v19, %v54_v18  ;;  %v146_v27 = vld [vmem:[%s537_s1 + $0x8] sm:$0xff]  ;;  %v109_v39 = vadd.s32 4294967272, %v90_v30  ;;  %v93_v41 = vsub.s32 %v90_v30, %v486_v35 }
  0x13   :  { %v66_v23 = vadd.f32 %v47_v21, %v46_v20  ;;  %v148_v25 = vld [vmem:[%s537_s1 + $0x18] sm:$0xff]  ;;  %v147_v26 = vld [vmem:[%s537_s1 + $0x10] sm:$0xff]  ;;  %v145_v28 = vld [vmem:[%s537_s1] sm:$0xff]  ;;  %v98_v37 = vsub.s32 %v95_v33, %v486_v35  ;;  %v105_v40 = vsub.s32 %v102_v34, %v486_v35  ;;  %vm156_vm6 = vcmask 261120  }
  0x14   :  { %73 = vadd.xlane.f32.xlu1 %v72_v10  ;;  %389 = vmatpush3.msra.mxu0 %v148_v25  ;;  %v112_v45 = vsub.s32 %v109_v39, %v486_v35  ;;  %v231_v1 = vld [vmem:[%s539_s3] sm:$0x3]  ;;  %vm243_vm7 = vcmask 1041408   ;;  %vm239_vm8 = vcmask 15360   ;;  %v325_v14 = vsub.s32 0, %v486_v35 }
  0x15   :  { %61 = vadd.xlane.f32.xlu0 %v60_v11  ;;  %390 = vmatprep.subr.mxu0 %v438_v24  ;;  %v56_v60 = vld [vmem:[#allocation2] sm:$0x3]  ;;  %vm361_vm9 = vcmask 7168  }
  0x16   :  { %391 = vmatpush3.msra.mxu0 %v147_v26  ;;  %400 = vmatpush3.msk.msra.mxu1 %vm243_vm7, %v231_v1  ;;  %v375_v2 = vld [vmem:[%s538_s2] ss:$0 sm:$0xff] }
  0x17   :  { %392 = vmatprep.subr.mxu0 %v438_v24  ;;  %v377_v7 = vld [vmem:[%s540_s4] ss:$0 sm:$0xff] }
  0x18   :  { %76 = vadd.xlane.f32.xlu1 %v75_v16  ;;  %393 = vmatpush3.msra.mxu0 %v146_v27 }
  0x19   :  { %64 = vadd.xlane.f32.xlu0 %v63_v17  ;;  %394 = vmatprep.subr.mxu0 %v438_v24  ;;  %v344_v17 = vsub.s32 1, %v486_v35 }
  0x1a   :  { %395 = vmatpush3.msra.mxu0 %v145_v28 }
  0x1c   :  { %79 = vadd.xlane.f32.xlu1 %v78_v22 }
  0x1d   :  { %67 = vadd.xlane.f32.xlu0 %v66_v23 }
  0x99   :  { %v71_v31 = vpop.xlane.xlu1 %70 }
  0x9a   :  { %v59_v32 = vpop.xlane.xlu0 %58  ;;  %v119_v48 = vrot.slane %v71_v31, %v93_v41 }
  0x9b   :  { %v94_v50 = vrot.slane %v59_v32, %v93_v41 }
  0x9d   :  { %v74_v36 = vpop.xlane.xlu1 %73 }
  0x9e   :  { %v62_v38 = vpop.xlane.xlu0 %61  ;;  %v123_v43 = vrot.slane %v74_v36, %v98_v37 }
  0x9f   :  { %v99_v46 = vrot.slane %v62_v38, %v98_v37 }
  0xa0   :  { %v124_v52 = vsel %vm100_vm2, %v123_v43, %v119_v48 }
  0xa1   :  { %v77_v42 = vpop.xlane.xlu1 %76  ;;  %v101_v55 = vsel %vm100_vm2, %v99_v46, %v94_v50 }
  0xa2   :  { %v65_v44 = vpop.xlane.xlu0 %64  ;;  %v128_v47 = vrot.slane %v77_v42, %v105_v40 }
  0xa3   :  { %v106_v49 = vrot.slane %v65_v44, %v105_v40 }
  0xa4   :  { %v129_v56 = vsel %vm107_vm3, %v128_v47, %v124_v52 }
  0xa5   :  { %v80_v51 = vpop.xlane.xlu1 %79  ;;  %v108_v58 = vsel %vm107_vm3, %v106_v49, %v101_v55 }
  0xa6   :  { %v133_v53 = vrot.slane %v80_v51, %v112_v45  ;;  %v68_v54 = vpop.xlane.xlu0 %67 }
  0xa7   :  { %v113_v57 = vrot.slane %v68_v54, %v112_v45 }
  0xa8   :  { %v134_v59 = vsel %vm114_vm4, %v133_v53, %v129_v56 }
  0xa9   :  { %v115_v61 = vsel %vm114_vm4, %v113_v57, %v108_v58 }
  0xaa   :  { %v136_v62 = vsel %vm135_vm5, %v134_v59, %v115_v61 }
  0xab   :  { %v138_v63 = vadd.f32 %v136_v62, %v56_v60 }
  0xad   :  { %140 = vst.msk [vmem:[#allocation2] sm:$0x3] %vm38_vm0, %v138_v63 }
  0xb4   :  { %v144_v0 = vld [vmem:[#allocation2] sm:$0x3] }
  0xb5   :  { %397 = vmatmul.mubr.msk.f32.vlgmr.msra.gmra.mxu0 %vm156_vm6, %v144_v0 }
 0x175   :  { %v226_v3 = vpop.f32.mrf.mxu0 }
 0x176   :  { %v227_v4 = vadd.f32 %v375_v2, %v226_v3 }
 0x177   :  { %v398_v5 = vpop.f32.mrf.mxu0 }
 0x178   :  { %v230_v6 = vmax.f32 %v227_v4, 0.0 }
 0x17a   :  { %402 = vmatmul.mubr.msk.f32.vlgmr.msra.gmra.mxu1 %vm239_vm8, %v230_v6 }
 0x23a   :  { %v313_v8 = vpop.f32.mrf.mxu1 }
 0x23b   :  { %v314_v9 = vadd.f32 %v377_v7, %v313_v8 }
 0x23c   :  { %v403_v10 = vpop.f32.mrf.mxu1 }
 0x23d   :  { %v380_v11 = vmul.f32 -1.442695, %v314_v9 }
 0x23f   :  { %409 = vpow2.f32 %v380_v11 }
 0x24c   :  { %v410_v12 = vpop.eup %409 }
 0x24d   :  { %v320_v13 = vadd.f32 1.0, %v410_v12 }
 0x24f   :  { %411 = vrcp.f32 %v320_v13 }
 0x25c   :  { %v412_v15 = vpop.eup %411 }
 0x25d   :  { %v326_v16 = vrot.slane %v412_v15, %v325_v14  ;;  %v345_v18 = vrot.slane %v412_v15, %v344_v17 }
 0x25f   :  { %332 = vbcast.lane.b32.xlu1 %v326_v16, 264  ;;  %328 = vbcast.lane.b32.xlu0 %v326_v16, 256 }
 0x263   :  { %336 = vbcast.lane.b32.xlu1 %v326_v16, 272  ;;  %347 = vbcast.lane.b32.xlu0 %v345_v18, 256 }
 0x267   :  { %340 = vbcast.lane.b32.xlu1 %v326_v16, 280  ;;  %355 = vbcast.lane.b32.xlu0 %v345_v18, 272 }
 0x26b   :  { %351 = vbcast.lane.b32.xlu1 %v345_v18, 264 }
 0x26f   :  { %359 = vbcast.lane.b32.xlu1 %v345_v18, 280 }
 0x2d1   :  { %v333_v19 = vpop.permute.xlu1 %332  ;;  %v329_v20 = vpop.permute.xlu0 %328 }
 0x2d2   :  { %363 = vst.msk [vmem:[%s541_s5 + $0x8] sm:$0xff] %vm361_vm9, %v333_v19  ;;  %362 = vst.msk [vmem:[%s541_s5] sm:$0xff] %vm361_vm9, %v329_v20 }
 0x2d5   :  { %v337_v21 = vpop.permute.xlu1 %336  ;;  %v348_v22 = vpop.permute.xlu0 %347 }
 0x2d6   :  { %364 = vst.msk [vmem:[%s541_s5 + $0x10] sm:$0xff] %vm361_vm9, %v337_v21  ;;  %366 = vst.msk [vmem:[%s541_s5 + $0x20] sm:$0xff] %vm361_vm9, %v348_v22 }
 0x2d9   :  { %v341_v23 = vpop.permute.xlu1 %340  ;;  %v356_v24 = vpop.permute.xlu0 %355 }
 0x2da   :  { %365 = vst.msk [vmem:[%s541_s5 + $0x18] sm:$0xff] %vm361_vm9, %v341_v23  ;;  %368 = vst.msk [vmem:[%s541_s5 + $0x30] sm:$0xff] %vm361_vm9, %v356_v24 }
 0x2dd   :  { %v352_v25 = vpop.permute.xlu1 %351 }
 0x2de   :  { %367 = vst.msk [vmem:[%s541_s5 + $0x28] sm:$0xff] %vm361_vm9, %v352_v25 }
 0x2e1   :  { %v360_v26 = vpop.permute.xlu1 %359 }
 0x2e2   :  { %369 = vst.msk [vmem:[%s541_s5 + $0x38] sm:$0xff] %vm361_vm9, %v360_v26 }
 0x2e3   :  { %374 = vsyncpa [#allocation4], 1 }

</bundles_post_ra>
